<compile_context>
chip_gen: v7x
topology: tpu7x:2x2x1
jax: 0.10.0
libtpu: 0.0.40
codegen_flags: <defaults>
</compile_context>

<pallas_src>
import functools

import jax
import jax.numpy as jnp
from jax.experimental import pallas as pl
from jax.experimental.pallas import tpu as pltpu


_TARGET_BLOCK_BYTES = 2 * 1024 * 1024   # ~2 MiB blocks already reach ~85% of HBM roofline


def _vmem_capacity_bytes() -> int:
    """Per-core VMEM capacity; conservative fallback if the query fails."""
    try:
        return int(pltpu.get_tpu_info().vmem_capacity_bytes)
    except Exception:
        return 64 * 1024 * 1024          # v7x per-TensorCore VMEM (smallest of the 3 gens)


# --------------------------------------------------------------------------- #
# Kernels
# --------------------------------------------------------------------------- #
def se_fused_kernel(x_ref, w1t_ref, w2t_ref, o_ref, *, inv_hw):
    """Pool + excitation + rescale on one (bt, C, HW) block; x read from HBM once."""
    # Squeeze: global average pool, f32 accumulation. HW is the full array dim,
    # so the masked partial vreg is handled exactly by Mosaic (no padding bias).
    pooled = jnp.sum(x_ref[...], axis=-1, dtype=jnp.float32) * inv_hw        # (bt, C)
    # Excitation: Linear(C->mid, no bias) + ReLU, Linear(mid->C, no bias) + Sigmoid.
    h = jnp.maximum(
        jnp.dot(pooled, w1t_ref[...], preferred_element_type=jnp.float32), 0.0)
    gate = jax.nn.sigmoid(
        jnp.dot(h, w2t_ref[...], preferred_element_type=jnp.float32))        # (bt, C)
    # Scale: re-index the ref (no multi-MB temporary live across the matmuls),
    # single fused multiply in the storage dtype straight into the store.
    o_ref[...] = x_ref[...] * gate.astype(o_ref.dtype)[:, :, None]


def se_pool_excite_kernel(x_ref, w1t_ref, w2t_ref, s_ref, *, inv_hw):
    """Two-pass path, pass 1: per-(b, c) sigmoid gate."""
    pooled = jnp.sum(x_ref[...], axis=-1, dtype=jnp.float32) * inv_hw        # (bt, C)
    h = jnp.maximum(
        jnp.dot(pooled, w1t_ref[...], preferred_element_type=jnp.float32), 0.0)
    gate = jax.nn.sigmoid(
        jnp.dot(h, w2t_ref[...], preferred_element_type=jnp.float32))
    s_ref[...] = gate[:, :, None]                                            # (bt, C, 1)


def se_scale_kernel(x_ref, s_ref, o_ref):
    """Two-pass path, pass 2: channel-wise rescale of one (1, C, hw_t) chunk."""
    o_ref[...] = x_ref[...] * s_ref[...].astype(o_ref.dtype)


# --------------------------------------------------------------------------- #
# Wrapper
# --------------------------------------------------------------------------- #
def se_attention(x, w1, w2):
    """SEAttention forward.

    x  : (B, C, H, W)
    w1 : (mid, C)  first Linear weight (PyTorch (out, in) layout), no bias
    w2 : (C, mid)  second Linear weight, no bias
    """
    B, C, H, W = x.shape
    mid = w1.shape[0]
    HW = H * W
    itemsize = jnp.dtype(x.dtype).itemsize

    x_flat = x.reshape(B, C, HW)             # contiguous merge of trailing dims: no HBM copy
    w1t = jnp.transpose(w1)                  # (C, mid)
    w2t = jnp.transpose(w2)                  # (mid, C)
    w_itemsize = jnp.dtype(w1.dtype).itemsize
    weight_bytes = (w1t.size + w2t.size) * w_itemsize
    x_bytes = B * C * HW * itemsize

    vmem_cap = _vmem_capacity_bytes()
    vmem_budget = vmem_cap // 2              # working-set budget for block sizing
    vmem_ceiling = (3 * vmem_cap) // 4       # hard clamp for vmem_limit_bytes (~48 MiB on v7x)

    def _limit(needed_bytes):
        return int(min(max(needed_bytes + (4 << 20), 8 << 20), vmem_ceiling))

    slab_bytes = C * HW * itemsize           # one batch element's (C, HW) plane

    # ---- fused single-pass tiling: ~2 MiB blocks, grid as deep as B allows ----
    bt = max(1, min(B, _TARGET_BLOCK_BYTES // max(1, slab_bytes)))
    bt = max(1, min(bt, B // 4)) if B >= 4 else 1     # keep >= 4 grid steps when possible
    grid_b = pl.cdiv(B, bt)
    fused_bytes = 4 * bt * slab_bytes + 2 * weight_bytes   # double-buffered in + out
    fused_fits = fused_bytes <= vmem_budget

    # ---- two-pass tiling: rescale pass gridded over (B, 128-lane HW chunks) ----
    n128 = HW // 128
    if n128 >= 2:
        cols = max(1, min(n128, _TARGET_BLOCK_BYTES // max(1, C * 128 * itemsize)))
        if B < 4:
            cols = min(cols, max(1, n128 // 2))       # force >= 2 HW chunks for pipeline depth
        hw_t = 128 * cols
    else:
        hw_t = HW
    grid_hw = pl.cdiv(HW, hw_t)
    two_pass_depth = B * grid_hw

    # Two-pass only when the fused path cannot pipeline (shallow grid) or cannot
    # fit its double-buffered block in VMEM; it costs 1.5x HBM traffic otherwise.
    use_two_pass = (not fused_fits) or (grid_b < 4 and two_pass_depth > grid_b)

    if not use_two_pass:
        out_flat = pl.pallas_call(
            functools.partial(se_fused_kernel, inv_hw=1.0 / HW),
            out_shape=jax.ShapeDtypeStruct((B, C, HW), x.dtype),
            grid_spec=pltpu.PrefetchScalarGridSpec(
                num_scalar_prefetch=0,
                grid=(grid_b,),
                in_specs=[
                    pl.BlockSpec((bt, C, HW), lambda b: (b, 0, 0)),
                    pl.BlockSpec((C, mid), lambda b: (0, 0)),
                    pl.BlockSpec((mid, C), lambda b: (0, 0)),
                ],
                out_specs=pl.BlockSpec((bt, C, HW), lambda b: (b, 0, 0)),
            ),
            compiler_params=pltpu.CompilerParams(
                dimension_semantics=("parallel",),
                vmem_limit_bytes=_limit(fused_bytes)),
            cost_estimate=pl.CostEstimate(
                flops=int(2 * B * C * HW + 4 * B * C * mid),
                transcendentals=int(B * C),
                bytes_accessed=int(2 * x_bytes + weight_bytes)),
        )(x_flat, w1t, w2t)
        return out_flat.reshape(B, C, H, W)

    # ------------------------- two-pass fallback path ------------------------- #
    pass1_bytes = 2 * slab_bytes + 2 * weight_bytes
    if pass1_bytes <= vmem_budget:
        gate = pl.pallas_call(
            functools.partial(se_pool_excite_kernel, inv_hw=1.0 / HW),
            out_shape=jax.ShapeDtypeStruct((B, C, 1), jnp.float32),
            grid_spec=pltpu.PrefetchScalarGridSpec(
                num_scalar_prefetch=0,
                grid=(B,),
                in_specs=[
                    pl.BlockSpec((1, C, HW), lambda b: (b, 0, 0)),
                    pl.BlockSpec((C, mid), lambda b: (0, 0)),
                    pl.BlockSpec((mid, C), lambda b: (0, 0)),
                ],
                out_specs=pl.BlockSpec((1, C, 1), lambda b: (b, 0, 0)),
            ),
            compiler_params=pltpu.CompilerParams(
                dimension_semantics=("parallel",),
                vmem_limit_bytes=_limit(pass1_bytes)),
            cost_estimate=pl.CostEstimate(
                flops=int(B * C * HW + 4 * B * C * mid),
                transcendentals=int(B * C),
                bytes_accessed=int(x_bytes + weight_bytes)),
        )(x_flat, w1t, w2t)
    else:
        # TODO(synk): HW-chunked Pallas pooling with in-kernel lane masking for
        # (C, HW) slabs too large for VMEM; plain-JAX squeeze/excitation fallback.
        pooled = jnp.mean(x_flat.astype(jnp.float32), axis=-1)
        h = jnp.maximum(pooled @ w1t.astype(jnp.float32), 0.0)
        gate = jax.nn.sigmoid(h @ w2t.astype(jnp.float32))[:, :, None]

    pass2_bytes = 4 * C * hw_t * itemsize + 4 * C * 4
    out_flat = pl.pallas_call(
        se_scale_kernel,
        out_shape=jax.ShapeDtypeStruct((B, C, HW), x.dtype),
        grid_spec=pltpu.PrefetchScalarGridSpec(
            num_scalar_prefetch=0,
            grid=(B, grid_hw),
            in_specs=[
                pl.BlockSpec((1, C, hw_t), lambda b, h: (b, 0, h)),
                pl.BlockSpec((1, C, 1), lambda b, h: (b, 0, 0)),
            ],
            out_specs=pl.BlockSpec((1, C, hw_t), lambda b, h: (b, 0, h)),
        ),
        compiler_params=pltpu.CompilerParams(
            dimension_semantics=("parallel", "parallel"),
            vmem_limit_bytes=_limit(pass2_bytes)),
        cost_estimate=pl.CostEstimate(
            flops=int(B * C * HW),
            transcendentals=0,
            bytes_accessed=int(2 * x_bytes + B * C * 4)),
    )(x_flat, gate)
    return out_flat.reshape(B, C, H, W)


def se_attention_ref(x, w1, w2):
    """Plain-JAX reference matching the PyTorch module semantics."""
    pooled = jnp.mean(x, axis=(2, 3))                        # (B, C)
    h = jnp.maximum(pooled @ w1.T, 0.0)                      # (B, mid)
    y = jax.nn.sigmoid(h @ w2.T)                             # (B, C)
    return x * y[:, :, None, None]


if __name__ == "__main__":
    key = jax.random.PRNGKey(0)
    kx, k1, k2, kx2, kx3 = jax.random.split(key, 5)

    # SEAttention(channel=64, reduction=16) -> mid = 4, no biases.
    C, reduction = 64, 16
    mid = C // reduction
    # Deterministic init mirroring init_weights(): normal(std=0.001).
    w1 = 0.001 * jax.random.normal(k1, (mid, C), dtype=jnp.float32)  # Linear(C, C//r)
    w2 = 0.001 * jax.random.normal(k2, (C, mid), dtype=jnp.float32)  # Linear(C//r, C)

    # (1) B=2, 16x16 (HW=256): fused grid would be too shallow -> two-pass path.
    x = jax.random.normal(kx, (2, C, 16, 16), dtype=jnp.float32)
    out = jax.block_until_ready(se_attention(x, w1, w2))
    assert out.shape == x.shape
    assert jnp.allclose(out, se_attention_ref(x, w1, w2), atol=1e-5, rtol=1e-5), \
        "mismatch vs reference (two-pass path)"

    # (2) B=2, 7x7 (HW=49, not a multiple of 128): fused path, masked partial vregs.
    x2 = jax.random.normal(kx2, (2, C, 7, 7), dtype=jnp.float32)
    out2 = jax.block_until_ready(se_attention(x2, w1, w2))
    assert out2.shape == x2.shape
    assert jnp.allclose(out2, se_attention_ref(x2, w1, w2), atol=1e-5, rtol=1e-5), \
        "mismatch vs reference (fused path, HW % 128 != 0)"

    # (3) B=9, 16x16: fused path with bt=2 and a partial (masked) batch edge block.
    x3 = jax.random.normal(kx3, (9, C, 16, 16), dtype=jnp.float32)
    out3 = jax.block_until_ready(se_attention(x3, w1, w2))
    assert out3.shape == x3.shape
    assert jnp.allclose(out3, se_attention_ref(x3, w1, w2), atol=1e-5, rtol=1e-5), \
        "mismatch vs reference (fused path, cdiv edge block)"

    print("KERNEL_OK")
</pallas_src>

<mosaic_0001>
module attributes {stable_mosaic.version = 11 : i64} {
  func.func @se_pool_excite_kernel(%arg0: i32, %arg1: memref<1x64x256xf32, #tpu.memory_space<vmem>>, %arg2: memref<64x4xf32, #tpu.memory_space<vmem>>, %arg3: memref<4x64xf32, #tpu.memory_space<vmem>>, %arg4: memref<1x64x1xf32, #tpu.memory_space<vmem>>) attributes {dimension_semantics = [#tpu.dimension_semantics<parallel>], iteration_bounds = array<i64: 2>, scalar_prefetch = 0 : i64, scratch_operands = 0 : i64, tpu.core_type = #tpu.core_type<tc>, window_params = [{transform_indices = @transform_0, window_bounds = array<i64: 1, 64, 256>}, {pipeline_mode = #tpu.pipeline_mode<synchronous>, transform_indices = @transform_1, window_bounds = array<i64: 64, 4>}, {pipeline_mode = #tpu.pipeline_mode<synchronous>, transform_indices = @transform_2, window_bounds = array<i64: 4, 64>}, {transform_indices = @transform_3, window_bounds = array<i64: 1, 64, 1>}]} {
    %c0 = arith.constant 0 : index
    %c0_0 = arith.constant 0 : index
    %c0_1 = arith.constant 0 : index
    %0 = vector.load %arg1[%c0, %c0_0, %c0_1] : memref<1x64x256xf32, #tpu.memory_space<vmem>>, vector<1x64x256xf32>
    %cst = arith.constant dense<0.000000e+00> : vector<1x64xf32>
    %1 = vector.multi_reduction <add>, %0, %cst [2] : vector<1x64x256xf32> to vector<1x64xf32>
    %cst_2 = arith.constant 3.906250e-03 : f32
    %2 = vector.broadcast %cst_2 : f32 to vector<1x64xf32>
    %3 = arith.mulf %1, %2 : vector<1x64xf32>
    %c0_3 = arith.constant 0 : index
    %c0_4 = arith.constant 0 : index
    %4 = vector.load %arg2[%c0_3, %c0_4] : memref<64x4xf32, #tpu.memory_space<vmem>>, vector<64x4xf32>
    %cst_5 = arith.constant dense<0.000000e+00> : vector<1x4xf32>
    %5 = tpu.matmul %3, %4, %cst_5 {dimension_numbers = #tpu.dot_dimension_numbers<[1], [0], [0], [1], [0, 0, 1, 1], [], []>} : vector<1x64xf32>, vector<64x4xf32>, vector<1x4xf32> -> vector<1x4xf32>
    %cst_6 = arith.constant 0.000000e+00 : f32
    %6 = vector.broadcast %cst_6 : f32 to vector<1x4xf32>
    %7 = arith.maximumf %5, %6 : vector<1x4xf32>
    %c0_7 = arith.constant 0 : index
    %c0_8 = arith.constant 0 : index
    %8 = vector.load %arg3[%c0_7, %c0_8] : memref<4x64xf32, #tpu.memory_space<vmem>>, vector<4x64xf32>
    %cst_9 = arith.constant dense<0.000000e+00> : vector<1x64xf32>
    %9 = tpu.matmul %7, %8, %cst_9 {dimension_numbers = #tpu.dot_dimension_numbers<[1], [0], [0], [1], [0, 0, 1, 1], [], []>} : vector<1x4xf32>, vector<4x64xf32>, vector<1x64xf32> -> vector<1x64xf32>
    %10 = arith.negf %9 : vector<1x64xf32>
    %11 = math.exp %10 : vector<1x64xf32>
    %cst_10 = arith.constant 1.000000e+00 : f32
    %12 = vector.broadcast %cst_10 : f32 to vector<1x64xf32>
    %13 = arith.addf %12, %11 : vector<1x64xf32>
    %14 = arith.divf %12, %13 : vector<1x64xf32>
    %15 = vector.shape_cast %14 : vector<1x64xf32> to vector<1x64x1xf32>
    %c0_11 = arith.constant 0 : index
    %c0_12 = arith.constant 0 : index
    %c0_13 = arith.constant 0 : index
    %16 = vector.load %arg4[%c0_11, %c0_12, %c0_13] : memref<1x64x1xf32, #tpu.memory_space<vmem>>, vector<1x64x1xf32>
    tpu.vector_store %arg4[%c0_11, %c0_12, %c0_13], %15 {strides = array<i32>} : memref<1x64x1xf32, #tpu.memory_space<vmem>>, vector<1x64x1xf32>,
    return
  }
  func.func @transform_0(%arg0: i32) -> (i32, i32, i32) {
    %c0_i32 = arith.constant 0 : i32
    %c0_i32_0 = arith.constant 0 : i32
    %c0_i32_1 = arith.constant 0 : i32
    return %arg0, %c0_i32, %c0_i32_0 : i32, i32, i32
  }
  func.func @transform_1(%arg0: i32) -> (i32, i32) {
    %c0_i32 = arith.constant 0 : i32
    %c0_i32_0 = arith.constant 0 : i32
    %c0_i32_1 = arith.constant 0 : i32
    return %c0_i32, %c0_i32_0 : i32, i32
  }
  func.func @transform_2(%arg0: i32) -> (i32, i32) {
    %c0_i32 = arith.constant 0 : i32
    %c0_i32_0 = arith.constant 0 : i32
    %c0_i32_1 = arith.constant 0 : i32
    return %c0_i32, %c0_i32_0 : i32, i32
  }
  func.func @transform_3(%arg0: i32) -> (i32, i32, i32) {
    %c0_i32 = arith.constant 0 : i32
    %c0_i32_0 = arith.constant 0 : i32
    %c0_i32_1 = arith.constant 0 : i32
    return %arg0, %c0_i32, %c0_i32_0 : i32, i32, i32
  }
}

</mosaic_0001>

<bundles_post_ra>
// kernel: tpu_custom_call.1
= control target key start
LH: loop header
LB: loop body
LE: loop exit
PB: predicated region body
PF: predicated region fallthrough
CT: control target
= control target key end

     0   :  { %8 = vsyncpa [#allocation3], 0  ;;  %s940_s0 = inlined_call_operand.hbm [shape: f32[2,64,256], index: 0, kind: input, shape index: {}]   ;;  %s941_s1 = inlined_call_operand.vmem [shape: f32[64,4], index: 1, kind: input, shape index: {}]   ;;  %s942_s2 = inlined_call_operand.vmem [shape: f32[4,64], index: 2, kind: input, shape index: {}]   ;;  %s943_s3 = inlined_call_operand.vmem [shape: f32[2,64,1], index: 3, kind: output, shape index: {}]  }
   0x1   :  { %10 = vsyncpa [#allocation3 + $0x1], 0  ;;  %s785_s12 = smov 0   ;;  %s787_s13 = smov 0  }
   0x2   :  { %s789_s14 = smov 0   ;;  %s791_s15 = smov 0  }
   0x3 LB: > { %s804_s16 = sadd.s32 4294967295, %s757_s15   ;;  %s807_s17 = sadd.s32 1, %s757_s15   ;;  %s757_s15 = sphi %s791_s15, %s950_s15   ;;  %s753_s14 = sphi %s789_s14, %s949_s14   ;;  %s749_s13 = sphi %s787_s13, %s948_s13   ;;  %s745_s12 = sphi %s785_s12, %s947_s12  }
   0x4   : > { %s20_s18 = ssub.s32 %s757_s15, %s807_s17  ;;  %s23_s19 = sadd.s32 1, %s753_s14 }
   0x5   : > { %p21_p0 = scmp.eq.s32.totalorder %s20_s18, 0  ;;  %p30_p1 = scmp.ne.s32.totalorder %s753_s14, %s749_s13 }
   0x6   : > { %p31_p2 = scmp.eq.s32.totalorder %s757_s15, 0  ;;  %p36_p3 = scmp.ne.s32.totalorder %s749_s13, %s745_s12 }
   0x7   : > { %s817_s20 = scalar_select %p21_p0, %s753_s14, %s23_s19  }
   0x8   : > { %p32_p4 = por %p31_p2, %p30_p1  ;;  %p37_p5 = scmp.eq.s32.totalorder %s804_s16, 0 }
   0x9   : > { %p651_p6 = scmp.lt.s32.totalorder %s757_s15, 2  ;;  %s134_s22 = sand.u32 1, %s753_s14  }
   0xa   : > { %p821_p7 = por %p37_p5, %p36_p3  ;;  %s583_s23 = sshll.u32 %s134_s22, 7 }
   0xb   : > { %s596_s24 = sshll.u32 %s757_s15, 11  ;;  %s138_s28 = scalar_lea.vmem [#allocation2], %s583_s23 }
   0xc   : > { %s830_s27 = scalar_lea.hbm %s940_s0, %s596_s24  ;;  %s145_s29 = sshll.u32 %s138_s28, 4  ;;  %s832_s29 = int_to_ptr.vmem [resolvable:$true] %s145_s29 }
   0xd   : > { %p834_p8 = pnand %p651_p6, %p32_p4  ;;  %s839_s4 = scalar_lea.sflag [#allocation3], %s134_s22 }
   0xe   : > { %s693_s5 = scalar_lea.hbm %s830_s27, 2048  ;;  %s698_s8 = scalar_lea.hbm %s940_s0, 4096 }
   0xf   : > { %p694_p10 = scmp.ne.s32.totalorder %s830_s27, %s693_s5  ;;  %p695_p11 = pneg %p834_p8 }
  0x10   : > { %p699_p0 = scmp.lt.u32.totalorder %s830_s27, %s940_s0  ;;  %p700_p1 = scmp.lt.u32.totalorder %s698_s8, %s693_s5 }
  0x11   : > { %p696_p12 = pnand %p695_p11, %p694_p10  ;;  %p702_p3 = scmp.lt.u32.totalorder %s693_s5, %s830_s27 }
  0x12   : > { %p701_p2 = por %p700_p1, %p699_p0 }
  0x13   : > { %p697_p13 = pneg %p696_p12 }
  0x14   : > { %p703_p4 = por %p702_p3, %p701_p2 }
  0x16   : > { %p704_p5 = pnand %p703_p4, %p697_p13 }
  0x18   : > { %707 = shalt.err (!%p704_p5)
}
  0x19   : > { %s708_s11 = scalar_lea.vmem %s832_s29, 2048  ;;  %s759_s12 = smov [#allocation2]  }
  0x1a   : > { %p709_p6 = scmp.ne.s32.totalorder %s832_s29, %s708_s11  ;;  %s713_s18 = sshll.u32 %s759_s12, 4  ;;  %s714_s18 = int_to_ptr.vmem [resolvable:$false] %s713_s18 }
  0x1b   : > { %s715_s19 = scalar_lea.vmem %s714_s18, 4096  ;;  %p716_p9 = scmp.lt.s32.totalorder %s832_s29, %s714_s18 }
  0x1c   : > { %p711_p10 = pnand %p709_p6, %p695_p11  ;;  %p717_p0 = scmp.lt.s32.totalorder %s715_s19, %s708_s11 }
  0x1e   : > { %p712_p12 = pneg %p711_p10  ;;  %p718_p1 = por %p717_p0, %p716_p9 }
  0x20   : > { %p719_p2 = pnand %p718_p1, %p712_p12 }
  0x22   : > { %722 = shalt.err (!%p719_p2)
}
  0x23   : > { %s760_s22 = smov 256   ;;  %s761_s23 = smov 16  }
  0x24   : > { %650 = dma.hbm_to_vmem [thread:$0]  (!%p834_p8), %s830_s27, 2048, %s832_s29, %s839_s4, %s760_s22, %s760_s22, %s761_s23  }
  0x25   : > { %p153_p11 = scmp.lt.s32.totalorder %s757_s15, 3  ;;  %p946_p13 = scmp.ge.s32.totalorder %s757_s15, 1 }
  0x27   : > { %p154_p3 = pnand %p946_p13, %p153_p11 }
  0x28   : > { %s159_s24 = sand.u32 (!%p154_p3), 1, %s749_s13  }
  0x29   : > { %157 = sbr.rel (%p154_p3) target bundleno = 798 (0x31e), region = 32  ;;  %s587_s25 = sshll.u32 (!%p154_p3), %s159_s24, 7 }
  0x2a   : > { %s160_s26 = scalar_lea.sflag (!%p154_p3), [#allocation3], %s159_s24  ;;  %s163_s28 = scalar_lea.vmem (!%p154_p3), [#allocation2], %s587_s25 }
  0x30   : > { %740 = dma.done.wait (%p821_p7), %s160_s26, 2048  }
  0x31   : > { %742 = vsyncadd (%p821_p7), %s160_s26, 4294965248  ;;  %v191_v0 = vld [vmem:[%s163_s28] sm:$0xff]  ;;  %v192_v1 = vld [vmem:[%s163_s28 + $0x8] sm:$0xff]  ;;  %v762_v27 = vmov 0.0|0.0   ;;  %vm763_vm0 = vmmov 0   ;;  %v764_v37 = vmov 0.0   ;;  %v255_v38 = vlaneseq }
  0x32   : > { %v195_v2 = vld [vmem:[%s163_s28 + $0x20] sm:$0xff]  ;;  %v207_v3 = vadd.f32 %v192_v1, %v191_v0  ;;  %v196_v4 = vld [vmem:[%s163_s28 + $0x28] sm:$0xff]  ;;  %v193_v5 = vld [vmem:[%s163_s28 + $0x10] sm:$0xff]  ;;  %633 = vmatprep.subr.bf16.mxu0 %v762_v27  ;;  %625 = vmatprep.mubr.msk.f32.mxu0 %vm763_vm0, %v764_v37  ;;  %vm266_vm1 = vcmask 130112   ;;  %vm273_vm2 = vcmask 195712   ;;  %vm280_vm3 = vcmask 261312  }
  0x33   : > { %v194_v6 = vld [vmem:[%s163_s28 + $0x18] sm:$0xff]  ;;  %v213_v7 = vadd.f32 %v196_v4, %v195_v2  ;;  %v197_v8 = vld [vmem:[%s163_s28 + $0x30] sm:$0xff]  ;;  %v199_v12 = vld [vmem:[%s163_s28 + $0x40] sm:$0xff]  ;;  %628 = vmatprep.subr.mxu1 %v764_v37  ;;  %630 = vmatprep.mubr.msk.f32.mxu1 %vm763_vm0, %v764_v37  ;;  %v256_v39 = vand.u32 127, %v255_v38  ;;  %v899_v40 = vshrl.u32 %v255_v38, 7  ;;  %vm287_vm4 = vcmask 326912  }
  0x34   : > { %v198_v9 = vld [vmem:[%s163_s28 + $0x38] sm:$0xff]  ;;  %208 = vadd.xlane.f32.xlu0 %v207_v3  ;;  %v210_v10 = vadd.f32 %v194_v6, %v193_v5  ;;  %v200_v13 = vld [vmem:[%s163_s28 + $0x48] sm:$0xff]  ;;  %v201_v14 = vld [vmem:[%s163_s28 + $0x50] sm:$0xff]  ;;  %vm294_vm5 = vcmask 392512   ;;  %vm301_vm6 = vcmask 458112   ;;  %vm308_vm7 = vcmask 523712  }
  0x35   : > { %214 = vadd.xlane.f32.xlu1 %v213_v7  ;;  %v216_v11 = vadd.f32 %v198_v9, %v197_v8  ;;  %v202_v15 = vld [vmem:[%s163_s28 + $0x58] sm:$0xff]  ;;  %v219_v16 = vadd.f32 %v200_v13, %v199_v12  ;;  %v203_v18 = vld [vmem:[%s163_s28 + $0x60] sm:$0xff]  ;;  %v204_v19 = vld [vmem:[%s163_s28 + $0x68] sm:$0xff]  ;;  %v261_v41 = vadd.s32 4294967288, %v256_v39  ;;  %v268_v43 = vadd.s32 4294967280, %v256_v39  ;;  %p186_p7 = scmp.lt.s32.totalorder %s804_s16, 1 }
  0x36   : > { %v222_v17 = vadd.f32 %v202_v15, %v201_v14  ;;  %v205_v20 = vld [vmem:[%s163_s28 + $0x70] sm:$0xff]  ;;  %v206_v21 = vld [vmem:[%s163_s28 + $0x78] sm:$0xff]  ;;  %v225_v22 = vadd.f32 %v204_v19, %v203_v18  ;;  %v239_v24 = vld [vmem:[%s941_s1] sm:$0xff]  ;;  %v275_v44 = vadd.s32 4294967272, %v256_v39  ;;  %v259_v46 = vsub.s32 %v256_v39, %v899_v40 }
  0x37   : > { %v228_v23 = vadd.f32 %v206_v21, %v205_v20  ;;  %v240_v25 = vld [vmem:[%s941_s1 + $0x8] sm:$0xff]  ;;  %v241_v28 = vld [vmem:[%s941_s1 + $0x10] sm:$0xff]  ;;  %v242_v29 = vld [vmem:[%s941_s1 + $0x18] sm:$0xff]  ;;  %v264_v48 = vsub.s32 %v261_v41, %v899_v40  ;;  %v282_v49 = vadd.s32 4294967264, %v256_v39  ;;  %v271_v50 = vsub.s32 %v268_v43, %v899_v40  ;;  %s952_s16 = smov (!%p186_p7, %s804_s16), 1 }
  0x38   : > { %211 = vadd.xlane.f32.xlu0 %v210_v10  ;;  %v634_v26 = vpack.c.bf16 %v240_v25, %v239_v24  ;;  %v637_v30 = vpack.c.bf16 %v242_v29, %v241_v28  ;;  %v243_v31 = vld [vmem:[%s941_s1 + $0x20] sm:$0xff]  ;;  %v244_v32 = vld [vmem:[%s941_s1 + $0x28] sm:$0xff]  ;;  %v245_v34 = vld [vmem:[%s941_s1 + $0x30] sm:$0xff]  ;;  %v278_v53 = vsub.s32 %v275_v44, %v899_v40  ;;  %v289_v54 = vadd.s32 4294967256, %v256_v39  ;;  %s597_s24 = sshll.u32 %s952_s16, 6 }
  0x39   : > { %217 = vadd.xlane.f32.xlu1 %v216_v11  ;;  %v640_v33 = vpack.c.bf16 %v244_v32, %v243_v31  ;;  %v246_v35 = vld [vmem:[%s941_s1 + $0x38] sm:$0xff]  ;;  %v285_v60 = vsub.s32 %v282_v49, %v899_v40  ;;  %v296_v61 = vadd.s32 4294967248, %v256_v39  ;;  %v303_v2 = vadd.s32 4294967240, %v256_v39  ;;  %s190_s28 = scalar_lea.vmem %s943_s3, %s597_s24 }
  0x3a   : > { %635 = vmatpush3.bf16.msra.mxu0 %v634_v26  ;;  %v643_v36 = vpack.c.bf16 %v246_v35, %v245_v34  ;;  %v292_v1 = vsub.s32 %v289_v54, %v899_v40  ;;  %vm310_vm8 = vcmask 523264   ;;  %vm389_vm9 = vcmask 1043456  }
  0x3b   : > { %636 = vmatprep.subr.bf16.mxu0 %v762_v27  ;;  %v299_v10 = vsub.s32 %v296_v61, %v899_v40  ;;  %v306_v13 = vsub.s32 %v303_v2, %v899_v40  ;;  %vm385_vm10 = vcmask 31744   ;;  %v471_v32 = vsub.s32 0, %v899_v40 }
  0x3c   : > { %220 = vadd.xlane.f32.xlu0 %v219_v16  ;;  %vm504_vm11 = vcmask 7168  }
  0x3d   : > { %223 = vadd.xlane.f32.xlu1 %v222_v17 }
  0x3e   : > { %638 = vmatpush3.bf16.msra.mxu0 %v637_v30 }
  0x3f   : > { %639 = vmatprep.subr.bf16.mxu0 %v762_v27 }
  0x40   : > { %226 = vadd.xlane.f32.xlu0 %v225_v22 }
  0x41   : > { %229 = vadd.xlane.f32.xlu1 %v228_v23  ;;  %v384_v23 = vld [vmem:[%s942_s2] sm:$0xf] }
  0x42   : > { %641 = vmatpush3.bf16.msra.mxu0 %v640_v33  ;;  %629 = vmatpush3.msk.msra.mxu1 %vm389_vm9, %v384_v23 }
  0x43   : > { %642 = vmatprep.subr.bf16.mxu0 %v762_v27 }
  0x46   : > { %644 = vmatpush3.bf16.msra.mxu0 %v643_v36 }
  0xc1   : > { %v209_v42 = vpop.xlane.xlu0 %208 }
  0xc2   : > { %v215_v45 = vpop.xlane.xlu1 %214  ;;  %v231_v47 = vmul.f32 0.00390625, %v209_v42 }
  0xc3   : > { %v233_v51 = vmul.f32 0.00390625, %v215_v45 }
  0xc4   : > { %v260_v58 = vrot.slane %v231_v47, %v259_v46 }
  0xc5   : > { %v212_v52 = vpop.xlane.xlu0 %211  ;;  %v272_v62 = vrot.slane %v233_v51, %v271_v50 }
  0xc6   : > { %v232_v55 = vmul.f32 0.00390625, %v212_v52  ;;  %v218_v56 = vpop.xlane.xlu1 %217 }
  0xc7   : > { %v234_v57 = vmul.f32 0.00390625, %v218_v56 }
  0xc8   : > { %v265_v59 = vrot.slane %v232_v55, %v264_v48 }
  0xc9   : > { %v279_v63 = vrot.slane %v234_v57, %v278_v53  ;;  %v221_v0 = vpop.xlane.xlu0 %220 }
  0xca   : > { %v267_v3 = vsel %vm266_vm1, %v265_v59, %v260_v58  ;;  %v235_v4 = vmul.f32 0.00390625, %v221_v0  ;;  %v224_v5 = vpop.xlane.xlu1 %223 }
  0xcb   : > { %v274_v6 = vsel %vm273_vm2, %v272_v62, %v267_v3  ;;  %v236_v7 = vmul.f32 0.00390625, %v224_v5 }
  0xcc   : > { %v281_v8 = vsel %vm280_vm3, %v279_v63, %v274_v6  ;;  %v286_v9 = vrot.slane %v235_v4, %v285_v60 }
  0xcd   : > { %v293_v11 = vrot.slane %v236_v7, %v292_v1  ;;  %v227_v12 = vpop.xlane.xlu0 %226 }
  0xce   : > { %v288_v14 = vsel %vm287_vm4, %v286_v9, %v281_v8  ;;  %v237_v15 = vmul.f32 0.00390625, %v227_v12  ;;  %v230_v16 = vpop.xlane.xlu1 %229 }
  0xcf   : > { %v238_v17 = vmul.f32 0.00390625, %v230_v16  ;;  %v295_v19 = vsel %vm294_vm5, %v293_v11, %v288_v14 }
  0xd0   : > { %v300_v18 = vrot.slane %v237_v15, %v299_v10 }
  0xd1   : > { %v307_v20 = vrot.slane %v238_v17, %v306_v13 }
  0xd2   : > { %v302_v21 = vsel %vm301_vm6, %v300_v18, %v295_v19 }
  0xd3   : > { %v309_v22 = vsel %vm308_vm7, %v307_v20, %v302_v21 }
  0xd4   : > { %626 = vmatmul.mubr.msk.f32.vlgmr.msra.gmra.mrb[0].mxu0 %vm310_vm8, %v309_v22 }
 0x1a7   : > { %v379_v24 = vpop.f32.mrb[0].mxu0 }
 0x1a8   : > { %v383_v25 = vmax.f32 %v379_v24, 0.0  ;;  %v627_v26 = vpop.f32.mrb[1].mxu0 }
 0x1aa   : > { %631 = vmatmul.mubr.msk.f32.vlgmr.msra.gmra.mrb[0].mxu1 %vm385_vm10, %v383_v25 }
 0x27d   : > { %v459_v27 = vpop.f32.mrb[0].mxu1 }
 0x27e   : > { %v593_v28 = vmul.f32 -1.442695, %v459_v27  ;;  %v632_v29 = vpop.f32.mrb[1].mxu1 }
 0x280   : > { %689 = vpow2.f32 %v593_v28 }
 0x28a   : > { %v690_v30 = vpop.eup %689 }
 0x28b   : > { %v466_v31 = vadd.f32 1.0, %v690_v30 }
 0x28d   : > { %691 = vrcp.f32 %v466_v31 }
 0x297   : > { %v692_v33 = vpop.eup %691 }
 0x298   : > { %v472_v34 = vrot.slane %v692_v33, %v471_v32 }
 0x29a   : > { %478 = vbcast.lane.b32.xlu1 %v472_v34, 264  ;;  %474 = vbcast.lane.b32.xlu0 %v472_v34, 256 }
 0x29e   : > { %482 = vbcast.lane.b32.xlu1 %v472_v34, 272  ;;  %490 = vbcast.lane.b32.xlu0 %v472_v34, 288 }
 0x2a2   : > { %486 = vbcast.lane.b32.xlu1 %v472_v34, 280  ;;  %498 = vbcast.lane.b32.xlu0 %v472_v34, 304 }
 0x2a6   : > { %494 = vbcast.lane.b32.xlu1 %v472_v34, 296 }
 0x2aa   : > { %502 = vbcast.lane.b32.xlu1 %v472_v34, 312 }
 0x30c   : > { %v479_v35 = vpop.permute.xlu1 %478  ;;  %v475_v36 = vpop.permute.xlu0 %474 }
 0x30d   : > { %506 = vst.msk [vmem:[%s190_s28 + $0x8] sm:$0xff] %vm504_vm11, %v479_v35  ;;  %505 = vst.msk [vmem:[%s190_s28] sm:$0xff] %vm504_vm11, %v475_v36 }
 0x310   : > { %v483_v37 = vpop.permute.xlu1 %482  ;;  %v491_v38 = vpop.permute.xlu0 %490 }
 0x311   : > { %507 = vst.msk [vmem:[%s190_s28 + $0x10] sm:$0xff] %vm504_vm11, %v483_v37  ;;  %509 = vst.msk [vmem:[%s190_s28 + $0x20] sm:$0xff] %vm504_vm11, %v491_v38 }
 0x314   : > { %v487_v39 = vpop.permute.xlu1 %486  ;;  %v499_v40 = vpop.permute.xlu0 %498 }
 0x315   : > { %508 = vst.msk [vmem:[%s190_s28 + $0x18] sm:$0xff] %vm504_vm11, %v487_v39  ;;  %511 = vst.msk [vmem:[%s190_s28 + $0x30] sm:$0xff] %vm504_vm11, %v499_v40 }
 0x318   : > { %v495_v41 = vpop.permute.xlu1 %494 }
 0x319   : > { %510 = vst.msk [vmem:[%s190_s28 + $0x28] sm:$0xff] %vm504_vm11, %v495_v41 }
 0x31c   : > { %v503_v42 = vpop.permute.xlu1 %502 }
 0x31d   : > { %512 = vst.msk [vmem:[%s190_s28 + $0x38] sm:$0xff] %vm504_vm11, %v503_v42 }
 0x31e PF: > { %p13_p8 = scmp.ge.s32.totalorder %s807_s17, 4   ;;  %s947_s12 = smov %s749_s13 }
 0x31f   : > { %s948_s13 = smov %s753_s14  ;;  %s949_s14 = smov %s817_s20 }
 0x320   : > { %s950_s15 = smov %s807_s17  ;;  %15 = sbr.rel (!%p13_p8) target bundleno = 3 (0x3), region = 72 }
 0x327   :  { %534 = vsyncpa [#allocation3], 1 }
 0x328   :  { %536 = vsyncpa [#allocation3 + $0x1], 1 }

</bundles_post_ra>
